<compile_context>
chip_gen: v7x
topology: tpu7x:2x2x1
jax: 0.10.0
libtpu: 0.0.40
codegen_flags: <defaults>
</compile_context>

<pallas_src>
import math
import functools

import jax
import jax.numpy as jnp
from jax import lax
from jax.experimental import pallas as pl
from jax.experimental.pallas import tpu as pltpu

_LOG2E = 1.4426950408889634


def _vmem_limit_bytes():
    """Generation-aware scoped-VMEM cap: ~100 MiB on v5e/v6e (128 MiB physical),
    ~56 MiB on v7x (64 MiB physical); conservative fallback if the query fails."""
    cap = None
    try:
        info = pltpu.get_tpu_info()
        for name in ("vmem_capacity_bytes", "vmem_size_bytes", "vmem_bytes"):
            val = getattr(info, name, None)
            if val:
                cap = int(val)
                break
    except Exception:
        cap = None
    if cap is None:
        cap = 64 * 1024 * 1024                    # v7x-sized conservative fallback
    return max(32 * 1024 * 1024, min(cap - 8 * 1024 * 1024, 100 * 1024 * 1024))


def _pick_attn_tiles(hw, num_heads, q_tile, kv_tile, vmem_limit):
    """Tile selection for kernel 2: big tiles by default (amortize ~0.35us/step overhead
    and K/V re-streaming), while keeping the [nh, tkv, tq] f32 score temporary bounded."""
    if hw % 128 != 0:                             # block must equal the full dim otherwise
        return (q_tile or hw), (kv_tile or hw)
    cands = [t for t in range(hw, 0, -128) if hw % t == 0]    # descending divisors of HW
    max_tq = 1024 if vmem_limit >= 96 * 1024 * 1024 else 512
    tq = q_tile if q_tile is not None else next(t for t in cands if t <= max_tq)
    if kv_tile is not None:
        tkv = kv_tile
    else:
        score_budget = 2 * 1024 * 1024            # cap on the f32 exp() intermediate
        tkv = cands[-1]
        for t in cands:
            if t <= 512 and num_heads * t * tq * 4 <= score_budget:
                tkv = t
                break
    assert hw % tq == 0 and hw % tkv == 0, "attention tiles must divide H*W"
    return tq, tkv


def groupnorm_qkv_kernel(x_ref, gamma_ref, beta_ref, pr_ref, pb_ref, w_ref,
                         qkv_ref, *, eps):
    # x block: [1, C, HW] f32 (channels-first, spatial on lanes).
    x = x_ref[0]                                               # [C, HW] f32
    # Per-channel spatial sums (lane reduce), stacked into one [C, 2] RHS.
    ch_sum = jnp.sum(x, axis=1, keepdims=True)                 # [C, 1]
    ch_sq = jnp.sum(x * x, axis=1, keepdims=True)              # [C, 1]
    stats = jnp.concatenate([ch_sum, ch_sq], axis=1)           # [C, 2]
    # pr: [G, C] group membership / (Cg*HW)  -> per-group (mean, E[x^2])
    # pb: [C, G] group membership            -> broadcast back to channels
    g_stats = jnp.dot(pr_ref[...], stats, preferred_element_type=jnp.float32)   # [G, 2]
    c_stats = jnp.dot(pb_ref[...], g_stats, preferred_element_type=jnp.float32) # [C, 2]
    mean = c_stats[:, 0:1]
    var = c_stats[:, 1:2] - mean * mean                        # biased var (matches torch)
    inv = lax.rsqrt(var + eps)
    xn = ((x - mean) * (inv * gamma_ref[...]) + beta_ref[...]).astype(jnp.bfloat16)
    # Fused qkv 1x1 conv: one [3C, C] @ [C, HW] matmul (scale * sqrt(log2 e) folded into
    # the q and k rows host-side); bf16 operands, f32 accumulation on the MXU.
    qkv_ref[0] = jnp.dot(w_ref[...], xn,
                         preferred_element_type=jnp.float32).astype(qkv_ref.dtype)


def flash_attn_proj_kernel(q_ref, k_ref, v_ref, x_ref, wproj_ref, bproj_ref,
                           o_ref, m_sc, l_sc, acc_sc, *, num_heads, head_dim):
    # Blocks: q/x/out [1, C, tq], k/v [1, C, tkv], wproj [C, C], bproj [C, 1].
    # Scratch: m/l [nh, 1, tq] f32, acc [nh, dh, tq] f32.
    ki = pl.program_id(2)

    @pl.when(ki == 0)
    def _():
        m_sc[...] = jnp.full_like(m_sc, -jnp.inf)
        l_sc[...] = jnp.zeros_like(l_sc)
        acc_sc[...] = jnp.zeros_like(acc_sc)

    tq = q_ref.shape[-1]
    tkv = k_ref.shape[-1]
    # Head-major channel layout -> free split of the sublane dim into (nh, dh).
    q3 = q_ref[0].reshape(num_heads, head_dim, tq)             # bf16, scale folded in
    k3 = k_ref[0].reshape(num_heads, head_dim, tkv)
    v3 = v_ref[0].reshape(num_heads, head_dim, tkv)

    # Batched over heads: s[h, s, t] = sum_c k[h,c,s] * q[h,c,t]  (scores^T, log2-scaled).
    s = lax.dot_general(k3, q3, (((1,), (1,)), ((0,), (0,))),
                        preferred_element_type=jnp.float32)    # [nh, tkv, tq] f32
    m_prev = m_sc[...]                                         # [nh, 1, tq]
    m_new = jnp.maximum(m_prev, jnp.max(s, axis=1, keepdims=True))
    alpha = jnp.exp2(m_prev - m_new)                           # log2(e) folded into Wq/Wk
    p = jnp.exp2(s - m_new)                                    # [nh, tkv, tq] f32
    l_sc[...] = alpha * l_sc[...] + jnp.sum(p, axis=1, keepdims=True)
    pv = lax.dot_general(v3, p.astype(jnp.bfloat16), (((2,), (1,)), ((0,), (0,))),
                         preferred_element_type=jnp.float32)   # [nh, dh, tq]
    acc_sc[...] = alpha * acc_sc[...] + pv
    m_sc[...] = m_new

    @pl.when(ki == pl.num_programs(2) - 1)
    def _():
        # Normalize directly into the bf16 proj input (no RMW + re-read of acc scratch).
        # approx=True is fine at the test tolerance; use approx=False for tighter bounds.
        inv_l = pl.reciprocal(l_sc[...], approx=True)          # [nh, 1, tq]
        h_bf = (acc_sc[...] * inv_l).astype(jnp.bfloat16)
        h_bf = h_bf.reshape(num_heads * head_dim, tq)          # [C, tq]
        out = jnp.dot(wproj_ref[...], h_bf, preferred_element_type=jnp.float32)
        out = out + bproj_ref[...] + x_ref[0].astype(jnp.float32)
        o_ref[0] = out.astype(o_ref.dtype)


def attention_block(x_nchw, params, *, num_heads=1, num_groups=32, eps=1e-5,
                    q_tile=None, kv_tile=None, kv_buffers=None):
    B, C, H, W = x_nchw.shape
    assert C % num_groups == 0 and C % num_heads == 0
    HW = H * W
    dh = C // num_heads
    Cg = C // num_groups
    vmem_limit = _vmem_limit_bytes()

    # NCHW -> [B, C, HW] is a pure reshape: no HBM transpose passes.
    x = x_nchw.reshape(B, C, HW)

    # ---- host-side weight preprocessing ----
    # Attention scale 1/sqrt(sqrt(dh)) and sqrt(log2 e) folded into Wq and Wk.
    qk_scale = (1.0 / math.sqrt(math.sqrt(dh))) * math.sqrt(_LOG2E)
    w = params["w_qkv"].reshape(num_heads, 3, dh, C)            # conv layout (head,{q,k,v},dh)
    wq = w[:, 0].reshape(C, C) * qk_scale                       # head-major rows
    wk = w[:, 1].reshape(C, C) * qk_scale
    wv = w[:, 2].reshape(C, C)
    w_stack = jnp.concatenate([wq, wk, wv], axis=0).astype(jnp.bfloat16)   # [3C, C]
    wproj = params["w_proj"].astype(jnp.bfloat16)
    bproj = params["b_proj"].reshape(C, 1).astype(jnp.float32)
    gamma = params["gamma"].reshape(C, 1).astype(jnp.float32)
    beta = params["beta"].reshape(C, 1).astype(jnp.float32)
    # Small group reduce / broadcast matrices (replace the old CxC membership matmul).
    gidx = jnp.arange(C, dtype=jnp.int32) // Cg
    grng = jnp.arange(num_groups, dtype=jnp.int32)
    pr = (grng[:, None] == gidx[None, :]).astype(jnp.float32) / float(Cg * HW)   # [G, C]
    pb = (gidx[:, None] == grng[None, :]).astype(jnp.float32)                    # [C, G]

    # ---- kernel 1: GroupNorm + fused qkv 1x1 conv (one batch element per grid step) ----
    qkv = pl.pallas_call(
        functools.partial(groupnorm_qkv_kernel, eps=eps),
        out_shape=jax.ShapeDtypeStruct((B, 3 * C, HW), jnp.bfloat16),
        grid_spec=pltpu.PrefetchScalarGridSpec(
            num_scalar_prefetch=0,
            grid=(B,),
            in_specs=[
                pl.BlockSpec((1, C, HW), lambda b: (b, 0, 0)),          # x
                pl.BlockSpec((C, 1), lambda b: (0, 0)),                 # gamma
                pl.BlockSpec((C, 1), lambda b: (0, 0)),                 # beta
                pl.BlockSpec((num_groups, C), lambda b: (0, 0)),        # group reduce / n
                pl.BlockSpec((C, num_groups), lambda b: (0, 0)),        # group broadcast
                pl.BlockSpec((3 * C, C), lambda b: (0, 0)),             # stacked Wqkv
            ],
            out_specs=pl.BlockSpec((1, 3 * C, HW), lambda b: (b, 0, 0)),
        ),
        compiler_params=pltpu.CompilerParams(
            dimension_semantics=("parallel",),
            vmem_limit_bytes=vmem_limit),
    )(x, gamma, beta, pr, pb, w_stack)

    # ---- kernel 2: flash attention + proj 1x1 conv + residual ----
    tq, tkv = _pick_attn_tiles(HW, num_heads, q_tile, kv_tile, vmem_limit)
    n_q = HW // tq
    n_kv = HW // tkv

    def _kv_spec(chan_block):
        idx = lambda b, qi, ki, cb=chan_block: (b, cb, ki)
        if kv_buffers is None:
            return pl.BlockSpec((1, C, tkv), idx)
        # Optional deeper pipelining for the streaming K/V inputs (try 3 if a bundle dump
        # shows exposed DMA latency at small tkv; revert if VMEM-constrained on v7x).
        return pl.BlockSpec((1, C, tkv), idx, pipeline_mode=pl.Buffered(kv_buffers))

    out = pl.pallas_call(
        functools.partial(flash_attn_proj_kernel, num_heads=num_heads, head_dim=dh),
        out_shape=jax.ShapeDtypeStruct((B, C, HW), x.dtype),
        grid_spec=pltpu.PrefetchScalarGridSpec(
            num_scalar_prefetch=0,
            grid=(B, n_q, n_kv),
            in_specs=[
                pl.BlockSpec((1, C, tq), lambda b, qi, ki: (b, 0, qi)),   # q rows of qkv
                _kv_spec(1),                                              # k rows of qkv
                _kv_spec(2),                                              # v rows of qkv
                pl.BlockSpec((1, C, tq), lambda b, qi, ki: (b, 0, qi)),   # x (residual)
                pl.BlockSpec((C, C), lambda b, qi, ki: (0, 0)),           # Wproj
                pl.BlockSpec((C, 1), lambda b, qi, ki: (0, 0)),           # bproj
            ],
            out_specs=pl.BlockSpec((1, C, tq), lambda b, qi, ki: (b, 0, qi)),
            scratch_shapes=[
                pltpu.VMEM((num_heads, 1, tq), jnp.float32),   # m (running max, log2 domain)
                pltpu.VMEM((num_heads, 1, tq), jnp.float32),   # l (running sum)
                pltpu.VMEM((num_heads, dh, tq), jnp.float32),  # acc (all heads)
            ],
        ),
        compiler_params=pltpu.CompilerParams(
            dimension_semantics=("parallel", "parallel", "arbitrary"),
            vmem_limit_bytes=vmem_limit),
    )(qkv, qkv, qkv, x, wproj, bproj)

    return out.reshape(B, C, H, W)


def reference(x, params, *, num_heads=1, num_groups=32, eps=1e-5):
    """Plain-JAX (f32) mirror of the PyTorch forward, for correctness checking."""
    B, C, H, W = x.shape
    dh = C // num_heads
    xg = x.reshape(B, num_groups, C // num_groups, H, W)
    mean = xg.mean(axis=(2, 3, 4), keepdims=True)
    var = xg.var(axis=(2, 3, 4), keepdims=True)
    xn = ((xg - mean) / jnp.sqrt(var + eps)).reshape(B, C, H, W)
    xn = xn * params["gamma"][None, :, None, None] + params["beta"][None, :, None, None]
    qkv = jnp.einsum('oc,bchw->bohw', params["w_qkv"], xn)
    qkv = qkv.reshape(B * num_heads, -1, H * W)
    q, k, v = qkv[:, :dh], qkv[:, dh:2 * dh], qkv[:, 2 * dh:]
    scale = 1.0 / math.sqrt(math.sqrt(dh))
    attn = jnp.einsum('bct,bcs->bts', q * scale, k * scale)
    attn = jax.nn.softmax(attn, axis=-1)
    h = jnp.einsum('bts,bcs->bct', attn, v).reshape(B, C, H, W)
    h = jnp.einsum('oc,bchw->bohw', params["w_proj"], h) + params["b_proj"][None, :, None, None]
    return h + x


if __name__ == "__main__":
    # GroupNorm(32, C) requires C % 32 == 0 -> C = 64; H = W = 16 gives HW = 256.
    B, C, H, W = 2, 64, 16, 16
    num_heads = 2

    key = jax.random.PRNGKey(0)
    k1, k2, k3, k4, k5, k6 = jax.random.split(key, 6)
    x = jax.random.normal(k1, (B, C, H, W), jnp.float32)
    params = {
        "gamma": 1.0 + 0.1 * jax.random.normal(k2, (C,), jnp.float32),   # GroupNorm weight
        "beta": 0.1 * jax.random.normal(k3, (C,), jnp.float32),          # GroupNorm bias
        "w_qkv": jax.random.normal(k4, (3 * C, C), jnp.float32) / math.sqrt(C),  # Conv2d(C,3C,1,bias=False)
        "w_proj": jax.random.normal(k5, (C, C), jnp.float32) / math.sqrt(C),     # Conv2d(C,C,1)
        "b_proj": 0.1 * jax.random.normal(k6, (C,), jnp.float32),
    }

    ref = reference(x, params, num_heads=num_heads)

    # Run 1: default (large) tiles -> single kv step per q tile.
    out_default = jax.block_until_ready(attention_block(x, params, num_heads=num_heads))
    # Run 2: forced 128x128 tiles -> exercises the multi-step online-softmax path.
    out_tiled = jax.block_until_ready(
        attention_block(x, params, num_heads=num_heads, q_tile=128, kv_tile=128))

    for out in (out_default, out_tiled):
        assert out.shape == x.shape
        max_err = float(jnp.max(jnp.abs(out - ref)))
        # bf16 MXU operands (f32 accumulation, f32 softmax/GroupNorm stats) vs an f32
        # reference -> tolerance is looser than a pure-f32 kernel.
        assert jnp.allclose(out, ref, rtol=5e-2, atol=5e-2), f"max_err={max_err}"
    print("KERNEL_OK")
</pallas_src>

<mosaic_0001>
module attributes {stable_mosaic.version = 11 : i64} {
  func.func @groupnorm_qkv_kernel(%arg0: i32, %arg1: memref<1x64x256xf32, #tpu.memory_space<vmem>>, %arg2: memref<64x1xf32, #tpu.memory_space<vmem>>, %arg3: memref<64x1xf32, #tpu.memory_space<vmem>>, %arg4: memref<32x64xf32, #tpu.memory_space<vmem>>, %arg5: memref<64x32xf32, #tpu.memory_space<vmem>>, %arg6: memref<192x64xbf16, #tpu.memory_space<vmem>>, %arg7: memref<1x192x256xbf16, #tpu.memory_space<vmem>>) attributes {dimension_semantics = [#tpu.dimension_semantics<parallel>], iteration_bounds = array<i64: 2>, scalar_prefetch = 0 : i64, scratch_operands = 0 : i64, tpu.core_type = #tpu.core_type<tc>, window_params = [{transform_indices = @transform_0, window_bounds = array<i64: 1, 64, 256>}, {pipeline_mode = #tpu.pipeline_mode<synchronous>, transform_indices = @transform_1, window_bounds = array<i64: 64, 1>}, {pipeline_mode = #tpu.pipeline_mode<synchronous>, transform_indices = @transform_2, window_bounds = array<i64: 64, 1>}, {pipeline_mode = #tpu.pipeline_mode<synchronous>, transform_indices = @transform_3, window_bounds = array<i64: 32, 64>}, {pipeline_mode = #tpu.pipeline_mode<synchronous>, transform_indices = @transform_4, window_bounds = array<i64: 64, 32>}, {pipeline_mode = #tpu.pipeline_mode<synchronous>, transform_indices = @transform_5, window_bounds = array<i64: 192, 64>}, {transform_indices = @transform_6, window_bounds = array<i64: 1, 192, 256>}]} {
    %c0 = arith.constant 0 : index
    %c0_0 = arith.constant 0 : index
    %c0_1 = arith.constant 0 : index
    %0 = vector.load %arg1[%c0, %c0_0, %c0_1] : memref<1x64x256xf32, #tpu.memory_space<vmem>>, vector<1x64x256xf32>
    %1 = vector.shape_cast %0 : vector<1x64x256xf32> to vector<64x256xf32>
    %cst = arith.constant dense<0.000000e+00> : vector<64xf32>
    %2 = vector.multi_reduction <add>, %1, %cst [1] : vector<64x256xf32> to vector<64xf32>
    %3 = vector.shape_cast %2 : vector<64xf32> to vector<64x1xf32>
    %4 = arith.mulf %1, %1 : vector<64x256xf32>
    %cst_2 = arith.constant dense<0.000000e+00> : vector<64xf32>
    %5 = vector.multi_reduction <add>, %4, %cst_2 [1] : vector<64x256xf32> to vector<64xf32>
    %6 = vector.shape_cast %5 : vector<64xf32> to vector<64x1xf32>
    %7 = tpu.concatenate %3, %6 in 1 : vector<64x1xf32>, vector<64x1xf32> -> vector<64x2xf32>
    %c0_3 = arith.constant 0 : index
    %c0_4 = arith.constant 0 : index
    %8 = vector.load %arg4[%c0_3, %c0_4] : memref<32x64xf32, #tpu.memory_space<vmem>>, vector<32x64xf32>
    %cst_5 = arith.constant dense<0.000000e+00> : vector<32x2xf32>
    %9 = tpu.matmul %8, %7, %cst_5 {dimension_numbers = #tpu.dot_dimension_numbers<[1], [0], [0], [1], [0, 0, 1, 1], [], []>} : vector<32x64xf32>, vector<64x2xf32>, vector<32x2xf32> -> vector<32x2xf32>
    %c0_6 = arith.constant 0 : index
    %c0_7 = arith.constant 0 : index
    %10 = vector.load %arg5[%c0_6, %c0_7] : memref<64x32xf32, #tpu.memory_space<vmem>>, vector<64x32xf32>
    %cst_8 = arith.constant dense<0.000000e+00> : vector<64x2xf32>
    %11 = tpu.matmul %10, %9, %cst_8 {dimension_numbers = #tpu.dot_dimension_numbers<[1], [0], [0], [1], [0, 0, 1, 1], [], []>} : vector<64x32xf32>, vector<32x2xf32>, vector<64x2xf32> -> vector<64x2xf32>
    %12 = vector.extract_strided_slice %11 {offsets = [0, 0], sizes = [64, 1], strides = [1, 1]} : vector<64x2xf32> to vector<64x1xf32>
    %13 = vector.extract_strided_slice %11 {offsets = [0, 1], sizes = [64, 1], strides = [1, 1]} : vector<64x2xf32> to vector<64x1xf32>
    %14 = arith.mulf %12, %12 : vector<64x1xf32>
    %15 = arith.subf %13, %14 : vector<64x1xf32>
    %cst_9 = arith.constant 9.99999974E-6 : f32
    %16 = vector.broadcast %cst_9 : f32 to vector<64x1xf32>
    %17 = arith.addf %15, %16 : vector<64x1xf32>
    %18 = math.rsqrt %17 : vector<64x1xf32>
    %19 = vector.broadcast %12 : vector<64x1xf32> to vector<64x256xf32>
    %20 = arith.subf %1, %19 : vector<64x256xf32>
    %c0_10 = arith.constant 0 : index
    %c0_11 = arith.constant 0 : index
    %21 = vector.load %arg2[%c0_10, %c0_11] : memref<64x1xf32, #tpu.memory_space<vmem>>, vector<64x1xf32>
    %22 = arith.mulf %18, %21 : vector<64x1xf32>
    %23 = vector.broadcast %22 : vector<64x1xf32> to vector<64x256xf32>
    %24 = arith.mulf %20, %23 : vector<64x256xf32>
    %c0_12 = arith.constant 0 : index
    %c0_13 = arith.constant 0 : index
    %25 = vector.load %arg3[%c0_12, %c0_13] : memref<64x1xf32, #tpu.memory_space<vmem>>, vector<64x1xf32>
    %26 = vector.broadcast %25 : vector<64x1xf32> to vector<64x256xf32>
    %27 = arith.addf %24, %26 : vector<64x256xf32>
    %28 = arith.truncf %27 : vector<64x256xf32> to vector<64x256xbf16>
    %c0_14 = arith.constant 0 : index
    %c0_15 = arith.constant 0 : index
    %29 = vector.load %arg6[%c0_14, %c0_15] : memref<192x64xbf16, #tpu.memory_space<vmem>>, vector<192x64xbf16>
    %cst_16 = arith.constant dense<0.000000e+00> : vector<192x256xf32>
    %30 = tpu.matmul %29, %28, %cst_16 {dimension_numbers = #tpu.dot_dimension_numbers<[1], [0], [0], [1], [0, 0, 1, 1], [], []>} : vector<192x64xbf16>, vector<64x256xbf16>, vector<192x256xf32> -> vector<192x256xf32>
    %31 = arith.truncf %30 : vector<192x256xf32> to vector<192x256xbf16>
    %c0_17 = arith.constant 0 : index
    %c0_18 = arith.constant 0 : index
    %c0_19 = arith.constant 0 : index
    %32 = vector.load %arg7[%c0_17, %c0_18, %c0_19] : memref<1x192x256xbf16, #tpu.memory_space<vmem>>, vector<1x192x256xbf16>
    %33 = vector.shape_cast %32 : vector<1x192x256xbf16> to vector<192x256xbf16>
    %34 = vector.shape_cast %31 : vector<192x256xbf16> to vector<1x192x256xbf16>
    tpu.vector_store %arg7[%c0_17, %c0_18, %c0_19], %34 {strides = array<i32>} : memref<1x192x256xbf16, #tpu.memory_space<vmem>>, vector<1x192x256xbf16>,
    return
  }
  func.func @transform_0(%arg0: i32) -> (i32, i32, i32) {
    %c0_i32 = arith.constant 0 : i32
    %c0_i32_0 = arith.constant 0 : i32
    %c0_i32_1 = arith.constant 0 : i32
    return %arg0, %c0_i32, %c0_i32_0 : i32, i32, i32
  }
  func.func @transform_1(%arg0: i32) -> (i32, i32) {
    %c0_i32 = arith.constant 0 : i32
    %c0_i32_0 = arith.constant 0 : i32
    %c0_i32_1 = arith.constant 0 : i32
    return %c0_i32, %c0_i32_0 : i32, i32
  }
  func.func @transform_2(%arg0: i32) -> (i32, i32) {
    %c0_i32 = arith.constant 0 : i32
    %c0_i32_0 = arith.constant 0 : i32
    %c0_i32_1 = arith.constant 0 : i32
    return %c0_i32, %c0_i32_0 : i32, i32
  }
  func.func @transform_3(%arg0: i32) -> (i32, i32) {
    %c0_i32 = arith.constant 0 : i32
    %c0_i32_0 = arith.constant 0 : i32
    %c0_i32_1 = arith.constant 0 : i32
    return %c0_i32, %c0_i32_0 : i32, i32
  }
  func.func @transform_4(%arg0: i32) -> (i32, i32) {
    %c0_i32 = arith.constant 0 : i32
    %c0_i32_0 = arith.constant 0 : i32
    %c0_i32_1 = arith.constant 0 : i32
    return %c0_i32, %c0_i32_0 : i32, i32
  }
  func.func @transform_5(%arg0: i32) -> (i32, i32) {
    %c0_i32 = arith.constant 0 : i32
    %c0_i32_0 = arith.constant 0 : i32
    %c0_i32_1 = arith.constant 0 : i32
    return %c0_i32, %c0_i32_0 : i32, i32
  }
  func.func @transform_6(%arg0: i32) -> (i32, i32, i32) {
    %c0_i32 = arith.constant 0 : i32
    %c0_i32_0 = arith.constant 0 : i32
    %c0_i32_1 = arith.constant 0 : i32
    return %arg0, %c0_i32, %c0_i32_0 : i32, i32, i32
  }
}

</mosaic_0001>

<bundles_post_ra>
// kernel: tpu_custom_call.1
= control target key start
LH: loop header
LB: loop body
LE: loop exit
PB: predicated region body
PF: predicated region fallthrough
CT: control target
= control target key end

     0   :  { %11 = vsyncpa [#allocation3], 0  ;;  %s2264_s0 = inlined_call_operand.vmem [shape: f32[2,64,256], index: 0, kind: input, shape index: {}]   ;;  %s2265_s1 = inlined_call_operand.vmem [shape: f32[64,1], index: 1, kind: input, shape index: {}]   ;;  %s2266_s2 = inlined_call_operand.vmem [shape: f32[64,1], index: 2, kind: input, shape index: {}]   ;;  %s2267_s3 = inlined_call_operand.vmem [shape: f32[32,64], index: 3, kind: input, shape index: {}]   ;;  %s2268_s4 = inlined_call_operand.vmem [shape: f32[64,32], index: 4, kind: input, shape index: {}]   ;;  %s2269_s5 = inlined_call_operand.vmem [shape: bf16[192,64], index: 5, kind: input, shape index: {}]   ;;  %s2270_s6 = inlined_call_operand.hbm [shape: bf16[2,192,256], index: 6, kind: output, shape index: {}]  }
   0x1   :  { %13 = vsyncpa [#allocation3 + $0x1], 0  ;;  %s1772_s21 = smov 0   ;;  %s1774_s22 = smov 0  }
   0x2   :  { %s1776_s23 = smov 0   ;;  %s1778_s24 = smov 0  }
   0x3 LB: > { %s1793_s25 = sadd.s32 4294967295, %s1729_s24   ;;  %s1393_s26 = sadd.s32 4294967294, %s1729_s24   ;;  %s1729_s24 = sphi %s1778_s24, %s2276_s24   ;;  %s1725_s23 = sphi %s1776_s23, %s2275_s23   ;;  %s1721_s22 = sphi %s1774_s22, %s2274_s22   ;;  %s1717_s21 = sphi %s1772_s21, %s2273_s21  }
   0x4   : > { %s1797_s27 = sadd.s32 1, %s1729_s24   ;;  %s157_s28 = sadd.s32 1, %s1725_s23 }
   0x5   : > { %s154_s29 = ssub.s32 %s1729_s24, %s1797_s27  ;;  %p167_p0 = scmp.ne.s32.totalorder %s1725_s23, %s1721_s22 }
   0x6   : > { %p155_p1 = scmp.eq.s32.totalorder %s154_s29, 0  ;;  %p168_p2 = scmp.eq.s32.totalorder %s1793_s25, 1 }
   0x7   : > { %p173_p3 = scmp.ne.s32.totalorder %s1721_s22, %s1717_s21  ;;  %p174_p4 = scmp.eq.s32.totalorder %s1393_s26, 1 }
   0x8   : > { %s1808_s30 = scalar_select %p155_p1, %s1725_s23, %s157_s28  }
   0x9   : > { %p1810_p5 = por %p168_p2, %p167_p0  ;;  %p1814_p6 = por %p174_p4, %p173_p3 }
   0xa   : > { %p1396_p7 = scmp.ge.s32.totalorder %s1729_s24, 1  ;;  %p215_p8 = scmp.lt.s32.totalorder %s1729_s24, 3 }
   0xc   : > { %p216_p9 = pnand %p1396_p7, %p215_p8 }
   0xd   : > { %p245_p10 = scmp.lt.s32.totalorder (!%p216_p9), %s1793_s25, 1  ;;  %v340_v48 = vld [vmem:[%s2267_s3] sm:$0xff] (!%p216_p9)  ;;  %vm344_vm0 = vcmask (!%p216_p9), 523264   ;;  %vm331_vm1 = vcmask (!%p216_p9), 7168   ;;  %vm450_vm2 = vcmask (!%p216_p9), 261120   ;;  %s1732_s29 = smov (!%p216_p9), 1  }
   0xe   : > { %219 = sbr.rel (%p216_p9) target bundleno = 1218 (0x4c2), region = 44  ;;  %1527 = vmatprep.mubr.msk.f32.mxu0 (!%p216_p9), %vm344_vm0, %v340_v48  ;;  %s242_s20 = sand.u32 (!%p216_p9), 1, %s1721_s22  }
   0xf   : > { %s1585_s26 = smul.u32 (!%p216_p9), 192, %s242_s20  ;;  %s1734_s15 = smov (!%p216_p9), [#allocation2]  }
  0x10   : > { %s1671_s16 = sshll.u32 (!%p216_p9), %s1734_s15, 4  ;;  %s1672_s16 = int_to_ptr.vmem [resolvable:$false] %s1671_s16 }
  0x11   : > { %s2186_s28 = scalar_lea.vmem (!%p216_p9), [#allocation2], %s1585_s26 }
  0x15   : > { %s246_s9 = scalar_select %p245_p10, %s1793_s25, 1 }
  0x17   : > { %s1462_s10 = sshll.u32 %s246_s9, 7  ;;  %s1586_s9 = smul.u32 3072, %s1793_s25 }
  0x18   : > { %s1825_s13 = scalar_lea.vmem %s2264_s0, %s1462_s10  ;;  %s1331_s10 = sshll.u32 %s2186_s28, 4  ;;  %s2217_s10 = int_to_ptr.vmem [resolvable:$true] %s1331_s10 }
  0x19   : > { %v1828_v0 = vld [vmem:[%s1825_s13 + $0x30] sm:$0xff]  ;;  %v1831_v1 = vld [vmem:[%s1825_s13 + $0x38] sm:$0xff]  ;;  %v1834_v2 = vld [vmem:[%s1825_s13] sm:$0xff]  ;;  %s2223_s25 = scalar_lea.sflag [#allocation3], %s242_s20  ;;  %s1667_s14 = scalar_lea.vmem %s2217_s10, 3072 }
  0x1a   : > { %v276_v3 = vadd.f32 %v1831_v1, %v1828_v0  ;;  %v1839_v4 = vld [vmem:[%s1825_s13 + $0x8] sm:$0xff]  ;;  %v291_v5 = vmul.f32 %v1834_v2, %v1834_v2  ;;  %v1844_v6 = vld [vmem:[%s1825_s13 + $0x10] sm:$0xff]  ;;  %v1847_v7 = vld [vmem:[%s1825_s13 + $0x18] sm:$0xff]  ;;  %v297_v17 = vmul.f32 %v1828_v0, %v1828_v0  ;;  %v298_v18 = vmul.f32 %v1831_v1, %v1831_v1  ;;  %p1668_p11 = scmp.ne.s32.totalorder %s2217_s10, %s1667_s14  ;;  %p1674_p0 = scmp.lt.s32.totalorder %s2217_s10, %s1672_s16 }
  0x1b   : > { %v267_v8 = vadd.f32 %v1839_v4, %v1834_v2  ;;  %v292_v9 = vmul.f32 %v1839_v4, %v1839_v4  ;;  %v293_v10 = vmul.f32 %v1844_v6, %v1844_v6  ;;  %v294_v11 = vmul.f32 %v1847_v7, %v1847_v7  ;;  %v1860_v14 = vld [vmem:[%s1825_s13 + $0x20] sm:$0xff]  ;;  %v1863_v15 = vld [vmem:[%s1825_s13 + $0x28] sm:$0xff]  ;;  %v1876_v24 = vld [vmem:[%s1825_s13 + $0x50] sm:$0xff] }
  0x1c   : > { %277 = vadd.xlane.f32.xlu1 %v276_v3  ;;  %v270_v13 = vadd.f32 %v1847_v7, %v1844_v6  ;;  %v273_v19 = vadd.f32 %v1863_v15, %v1860_v14  ;;  %v295_v20 = vmul.f32 %v1860_v14, %v1860_v14  ;;  %v296_v21 = vmul.f32 %v1863_v15, %v1863_v15  ;;  %v1879_v25 = vld [vmem:[%s1825_s13 + $0x58] sm:$0xff]  ;;  %v1882_v26 = vld [vmem:[%s1825_s13 + $0x40] sm:$0xff]  ;;  %v1885_v27 = vld [vmem:[%s1825_s13 + $0x48] sm:$0xff]  ;;  %p1669_p12 = pnand %p1668_p11, %p1810_p5 }
  0x1d   : > { %268 = vadd.xlane.f32.xlu0 %v267_v8  ;;  %v307_v12 = vadd.f32 %v292_v9, %v291_v5  ;;  %v310_v16 = vadd.f32 %v294_v11, %v293_v10  ;;  %v316_v22 = vadd.f32 %v298_v18, %v297_v17  ;;  %v282_v28 = vadd.f32 %v1879_v25, %v1876_v24  ;;  %v1900_v36 = vld [vmem:[%s1825_s13 + $0x70] sm:$0xff]  ;;  %v1903_v37 = vld [vmem:[%s1825_s13 + $0x78] sm:$0xff]  ;;  %v1906_v38 = vld [vmem:[%s1825_s13 + $0x60] sm:$0xff] }
  0x1e   : > { %v313_v23 = vadd.f32 %v296_v21, %v295_v20  ;;  %v301_v29 = vmul.f32 %v1876_v24, %v1876_v24  ;;  %v302_v30 = vmul.f32 %v1879_v25, %v1879_v25  ;;  %v279_v31 = vadd.f32 %v1885_v27, %v1882_v26  ;;  %v1909_v39 = vld [vmem:[%s1825_s13 + $0x68] sm:$0xff]  ;;  %s2215_s13 = scalar_lea.hbm %s2270_s6, %s1586_s9  ;;  %p1670_p13 = pneg %p1669_p12 }
  0x1f   : > { %v299_v32 = vmul.f32 %v1882_v26, %v1882_v26  ;;  %v300_v33 = vmul.f32 %v1885_v27, %v1885_v27  ;;  %v288_v40 = vadd.f32 %v1903_v37, %v1900_v36  ;;  %v305_v41 = vmul.f32 %v1900_v36, %v1900_v36  ;;  %v341_v21 = vld [vmem:[%s2267_s3 + $0x8] sm:$0xff] }
  0x20   : > { %308 = vadd.xlane.f32.xlu1 %v307_v12  ;;  %v322_v34 = vadd.f32 %v302_v30, %v301_v29  ;;  %v306_v42 = vmul.f32 %v1903_v37, %v1903_v37  ;;  %v285_v43 = vadd.f32 %v1909_v39, %v1906_v38  ;;  %v303_v44 = vmul.f32 %v1906_v38, %v1906_v38 }
  0x21   : > { %271 = vadd.xlane.f32.xlu0 %v270_v13  ;;  %v319_v35 = vadd.f32 %v300_v33, %v299_v32  ;;  %v304_v45 = vmul.f32 %v1909_v39, %v1909_v39 }
  0x22   : > { %v328_v46 = vadd.f32 %v306_v42, %v305_v41  ;;  %v445_v41 = vld [vmem:[%s2268_s4 + $0x18] sm:$0xff]  ;;  %v446_v42 = vld [vmem:[%s2268_s4 + $0x20] sm:$0xff] }
  0x23   : > { %v325_v47 = vadd.f32 %v304_v45, %v303_v44  ;;  %v448_v44 = vld [vmem:[%s2268_s4 + $0x30] sm:$0xff]  ;;  %v449_v45 = vld [vmem:[%s2268_s4 + $0x38] sm:$0xff] }
  0x24   : > { %311 = vadd.xlane.f32.xlu1 %v310_v16 }
  0x25   : > { %274 = vadd.xlane.f32.xlu0 %v273_v19 }
  0x28   : > { %317 = vadd.xlane.f32.xlu1 %v316_v22  ;;  %v342_v22 = vld [vmem:[%s2267_s3 + $0x10] sm:$0xff] }
  0x29   : > { %314 = vadd.xlane.f32.xlu0 %v313_v23  ;;  %v343_v23 = vld [vmem:[%s2267_s3 + $0x18] sm:$0xff] }
  0x2c   : > { %283 = vadd.xlane.f32.xlu1 %v282_v28  ;;  %v442_v28 = vld [vmem:[%s2268_s4] sm:$0xff] }
  0x2d   : > { %280 = vadd.xlane.f32.xlu0 %v279_v31  ;;  %1541 = vmatprep.mubr.msk.f32.mxu1 %vm450_vm2, %v442_v28 }
  0x30   : > { %323 = vadd.xlane.f32.xlu1 %v322_v34 }
  0x31   : > { %320 = vadd.xlane.f32.xlu0 %v319_v35  ;;  %v443_v35 = vld [vmem:[%s2268_s4 + $0x8] sm:$0xff] }
  0x34   : > { %289 = vadd.xlane.f32.xlu1 %v288_v40  ;;  %v444_v40 = vld [vmem:[%s2268_s4 + $0x10] sm:$0xff] }
  0x35   : > { %286 = vadd.xlane.f32.xlu0 %v285_v43  ;;  %v447_v43 = vld [vmem:[%s2268_s4 + $0x28] sm:$0xff] }
  0x38   : > { %329 = vadd.xlane.f32.xlu1 %v328_v46  ;;  %v1731_v46 = vmov 0  }
  0x39   : > { %326 = vadd.xlane.f32.xlu0 %v325_v47  ;;  %1632 = vset.pattern.permute.xlu1 %v1731_v46 }
  0x3a   : > { %1631 = vset.pattern.permute.xlu0 %v1731_v46 }
  0xa9   : > { %v278_v49 = vpop.xlane.xlu1 %277 }
  0xaa   : > { %v269_v50 = vpop.xlane.xlu0 %268 }
  0xad   : > { %v309_v51 = vpop.xlane.xlu1 %308 }
  0xae   : > { %v272_v52 = vpop.xlane.xlu0 %271  ;;  %v332_v54 = vsel %vm331_vm1, %v269_v50, %v309_v51 }
  0xb1   : > { %v312_v53 = vpop.xlane.xlu1 %311 }
  0xb2   : > { %v333_v55 = vsel %vm331_vm1, %v272_v52, %v312_v53  ;;  %v275_v56 = vpop.xlane.xlu0 %274 }
  0xb3   : > { %v1553_v57 = vpack.c.bf16 %v333_v55, %v332_v54 }
  0xb5   : > { %v318_v58 = vpop.xlane.xlu1 %317  ;;  %1554 = vmatprep.subr.bf16.mxu0 %v1553_v57 }
  0xb6   : > { %v335_v59 = vsel %vm331_vm1, %v278_v49, %v318_v58  ;;  %v315_v60 = vpop.xlane.xlu0 %314  ;;  %1556 = vmatpush3.bf16.msra.mxu0 %v1553_v57 }
  0xb7   : > { %v334_v61 = vsel %vm331_vm1, %v275_v56, %v315_v60 }
  0xb8   : > { %v1557_v62 = vpack.c.bf16 %v335_v59, %v334_v61 }
  0xb9   : > { %v284_v63 = vpop.xlane.xlu1 %283 }
  0xba   : > { %1558 = vmatprep.subr.bf16.mxu0 %v1557_v62  ;;  %v281_v3 = vpop.xlane.xlu0 %280 }
  0xbb   : > { %1560 = vmatpush3.bf16.msra.mxu0 %v1557_v62 }
  0xbd   : > { %v324_v5 = vpop.xlane.xlu1 %323 }
  0xbe   : > { %v337_v8 = vsel %vm331_vm1, %v284_v63, %v324_v5  ;;  %v321_v9 = vpop.xlane.xlu0 %320  ;;  %v700_v63 = vld [vmem:[%s2265_s1] sm:$0xff]  ;;  %v702_v5 = vld [vmem:[%s2265_s1 + $0x10] sm:$0xff] }
  0xbf   : > { %v336_v10 = vsel %vm331_vm1, %v281_v3, %v321_v9  ;;  %v701_v3 = vld [vmem:[%s2265_s1 + $0x8] sm:$0xff]  ;;  %v704_v9 = vld [vmem:[%s2265_s1 + $0x20] sm:$0xff] }
  0xc0   : > { %v1561_v11 = vpack.c.bf16 %v337_v8, %v336_v10  ;;  %v703_v8 = vld [vmem:[%s2265_s1 + $0x18] sm:$0xff]  ;;  %v705_v10 = vld [vmem:[%s2265_s1 + $0x28] sm:$0xff] }
  0xc1   : > { %v290_v12 = vpop.xlane.xlu1 %289 }
  0xc2   : > { %1562 = vmatprep.subr.bf16.mxu0 %v1561_v11  ;;  %v287_v13 = vpop.xlane.xlu0 %286 }
  0xc3   : > { %1564 = vmatpush3.bf16.msra.mxu0 %v1561_v11  ;;  %v706_v11 = vld [vmem:[%s2265_s1 + $0x30] sm:$0xff] }
  0xc5   : > { %v330_v16 = vpop.xlane.xlu1 %329 }
  0xc6   : > { %v339_v17 = vsel %vm331_vm1, %v290_v12, %v330_v16  ;;  %v327_v18 = vpop.xlane.xlu0 %326  ;;  %v707_v12 = vld [vmem:[%s2265_s1 + $0x38] sm:$0xff]  ;;  %v806_v16 = vld [vmem:[%s2266_s2 + $0x10] sm:$0xff] }
  0xc7   : > { %v338_v19 = vsel %vm331_vm1, %v287_v13, %v327_v18  ;;  %v804_v13 = vld [vmem:[%s2266_s2] sm:$0xff]  ;;  %v805_v18 = vld [vmem:[%s2266_s2 + $0x8] sm:$0xff] }
  0xc8   : > { %v1565_v20 = vpack.c.bf16 %v339_v17, %v338_v19  ;;  %v808_v17 = vld [vmem:[%s2266_s2 + $0x20] sm:$0xff]  ;;  %v1733_v19 = vmov 1  }
  0xca   : > { %1566 = vmatprep.subr.bf16.mxu0 %v1565_v20 }
  0xcb   : > { %1568 = vmatpush3.bf16.msra.mxu0 %v1565_v20  ;;  %v807_v20 = vld [vmem:[%s2266_s2 + $0x18] sm:$0xff] }
  0xce   : > { %1528 = vmatmul.mubr.msk.f32.vlgmr.msra.gmra.mrb[0].mxu0 %vm344_vm0, %v341_v21  ;;  %v809_v21 = vld [vmem:[%s2266_s2 + $0x28] sm:$0xff] }
  0xcf   : > { %1530 = vmatprep.mubr.msk.f32.mxu0 %vm344_vm0, %v342_v22 }
  0xd2   : > { %1531 = vmatmul.mubr.msk.f32.gmra.mrb[2].mxu0 %vm344_vm0, %v343_v23 }
  0xd3   : > { %1028 = vmatprep.mubr.bf16.mxu0 %v1731_v46 }
 0x1a1   : > { %v1529_v29 = vpop.f32.mrb[0].mxu0 }
 0x1a2   : > { %v423_v30 = vpop.f32.mrb[1].mxu0 }
 0x1a3   : > { %v1569_v31 = vpack.c.bf16 %v1529_v29, %v423_v30 }
 0x1a5   : > { %v1532_v32 = vpop.f32.mrb[2].mxu0  ;;  %1570 = vmatprep.subr.bf16.mxu1 %v1569_v31 }
 0x1a6   : > { %v433_v33 = vpop.f32.mrb[3].mxu0  ;;  %1572 = vmatpush3.bf16.msra.mxu1 %v1569_v31 }
 0x1a7   : > { %v1573_v34 = vpack.c.bf16 %v1532_v32, %v433_v33 }
 0x1a9   : > { %1574 = vmatprep.subr.bf16.mxu1 %v1573_v34 }
 0x1aa   : > { %1576 = vmatpush3.bf16.msra.mxu1 %v1573_v34 }
 0x1ad   : > { %1542 = vmatmul.mubr.msk.f32.vlgmr.msra.gmra.mrb[0].mxu1 %vm450_vm2, %v443_v35 }
 0x1ae   : > { %1544 = vmatprep.mubr.msk.f32.mxu1 %vm450_vm2, %v444_v40 }
 0x1b1   : > { %1545 = vmatmul.mubr.msk.f32.gmra.mrb[2].mxu1 %vm450_vm2, %v445_v41 }
 0x1b2   : > { %1547 = vmatprep.mubr.msk.f32.mxu1 %vm450_vm2, %v446_v42 }
 0x1b5   : > { %1548 = vmatmul.mubr.msk.f32.gmra.mrb[4].mxu1 %vm450_vm2, %v447_v43 }
 0x1b6   : > { %1550 = vmatprep.mubr.msk.f32.mxu1 %vm450_vm2, %v448_v44 }
 0x1b9   : > { %1551 = vmatmul.mubr.msk.f32.gmra.mrb[6].mxu1 %vm450_vm2, %v449_v45 }
 0x1ba   : > { %1078 = vmatprep.mubr.bf16.mxu1 %v1731_v46 }
 0x280   : > { %v1983_v47 = vpop.f32.mrb[0].mxu1 }
 0x281   : > { %v581_v48 = vmul.f32 %v1983_v47, %v1983_v47  ;;  %v1987_v49 = vpop.f32.mrb[1].mxu1 }
 0x282   : > { %v580_v50 = vmul.f32 %v1987_v49, %v1987_v49 }
 0x283   : > { %598 = vrot.lane.b32.xlu1 %v581_v48, %s1732_s29 }
 0x284   : > { %596 = vrot.lane.b32.xlu0 %v580_v50, %s1732_s29  ;;  %v1993_v51 = vpop.f32.mrb[2].mxu1 }
 0x285   : > { %v583_v52 = vmul.f32 %v1993_v51, %v1993_v51  ;;  %v1997_v53 = vpop.f32.mrb[3].mxu1 }
 0x286   : > { %v582_v55 = vmul.f32 %v1997_v53, %v1997_v53 }
 0x287   : > { %602 = vrot.lane.b32.xlu1 %v583_v52, %s1732_s29 }
 0x288   : > { %v2000_v54 = vpop.f32.mrb[4].mxu1 }
 0x289   : > { %v2004_v56 = vpop.f32.mrb[5].mxu1  ;;  %v585_v59 = vmul.f32 %v2000_v54, %v2000_v54 }
 0x28a   : > { %v584_v57 = vmul.f32 %v2004_v56, %v2004_v56 }
 0x28b   : > { %600 = vrot.lane.b32.xlu1 %v582_v55, %s1732_s29 }
 0x28c   : > { %604 = vrot.lane.b32.xlu0 %v584_v57, %s1732_s29  ;;  %v2010_v58 = vpop.f32.mrb[6].mxu1 }
 0x28d   : > { %v2014_v60 = vpop.f32.mrb[7].mxu1  ;;  %v587_v62 = vmul.f32 %v2010_v58, %v2010_v58 }
 0x28e   : > { %v586_v61 = vmul.f32 %v2014_v60, %v2014_v60 }
 0x28f   : > { %606 = vrot.lane.b32.xlu1 %v585_v59, %s1732_s29 }
 0x290   : > { %608 = vrot.lane.b32.xlu0 %v586_v61, %s1732_s29 }
 0x293   : > { %610 = vrot.lane.b32.xlu1 %v587_v62, %s1732_s29 }
 0x294   : > { %716 = vrot.lane.b32.xlu0 %v700_v63, %s1732_s29 }
 0x297   : > { %718 = vrot.lane.b32.xlu1 %v701_v3, %s1732_s29 }
 0x298   : > { %720 = vrot.lane.b32.xlu0 %v702_v5, %s1732_s29 }
 0x29b   : > { %722 = vrot.lane.b32.xlu1 %v703_v8, %s1732_s29 }
 0x29c   : > { %724 = vrot.lane.b32.xlu0 %v704_v9, %s1732_s29 }
 0x29f   : > { %726 = vrot.lane.b32.xlu1 %v705_v10, %s1732_s29 }
 0x2a0   : > { %728 = vrot.lane.b32.xlu0 %v706_v11, %s1732_s29 }
 0x2a3   : > { %730 = vrot.lane.b32.xlu1 %v707_v12, %s1732_s29  ;;  %s1673_s29 = scalar_lea.vmem %s1672_s16, 6144 }
 0x2a4   : > { %646 = vperm.xlu0 %1631, %v1987_v49   ;;  %p1675_p1 = scmp.lt.s32.totalorder %s1673_s29, %s1667_s14 }
 0x2a6   : > { %p1676_p2 = por %p1675_p1, %p1674_p0 }
 0x2a7   : > { %651 = vperm.xlu1 %1632, %v1983_v47  }
 0x2a8   : > { %814 = vperm.xlu0 %1631, %v804_v13   ;;  %p1677_p3 = pnand %p1676_p2, %p1670_p13 }
 0x2ab   : > { %656 = vperm.xlu1 %1632, %v1997_v53  }
 0x2ac   : > { %824 = vperm.xlu0 %1631, %v806_v16  }
 0x2af   : > { %661 = vperm.xlu1 %1632, %v1993_v51  }
 0x2b0   : > { %834 = vperm.xlu0 %1631, %v808_v17  }
 0x2b3   : > { %819 = vperm.xlu1 %1632, %v805_v18  }
 0x2b4   : > { %1633 = vset.pattern.permute.xlu0 %v1733_v19 }
 0x2b7   : > { %666 = vperm.xlu1 %1632, %v2004_v56  }
 0x2bb   : > { %671 = vperm.xlu1 %1632, %v2000_v54  }
 0x2bf   : > { %829 = vperm.xlu1 %1632, %v807_v20   ;;  %v810_v20 = vld [vmem:[%s2266_s2 + $0x30] sm:$0xff] }
 0x2c3   : > { %676 = vperm.xlu1 %1632, %v2014_v60  }
 0x2c7   : > { %681 = vperm.xlu1 %1632, %v2010_v58  }
 0x2cb   : > { %839 = vperm.xlu1 %1632, %v809_v21  }
 0x2cf   : > { %1634 = vset.pattern.permute.xlu1 %v1733_v19 }
 0x2f5   : > { %v599_v22 = vpop.permute.xlu1 %598 }
 0x2f6   : > { %v597_v23 = vpop.permute.xlu0 %596  ;;  %v621_v28 = vsub.f32 %v1983_v47, %v599_v22 }
 0x2f7   : > { %v620_v29 = vsub.f32 %v1987_v49, %v597_v23 }
 0x2f8   : > { %v629_v32 = vadd.f32 1e-05, %v621_v28 }
 0x2f9   : > { %v628_v30 = vadd.f32 1e-05, %v620_v29  ;;  %v603_v31 = vpop.permute.xlu1 %602  ;;  %v811_v29 = vld [vmem:[%s2266_s2 + $0x38] sm:$0xff] }
 0x2fa   : > { %v623_v33 = vsub.f32 %v1993_v51, %v603_v31 }
 0x2fb   : > { %1651 = vrsqrt.f32 %v628_v30 }
 0x2fc   : > { %1653 = vrsqrt.f32 %v629_v32  ;;  %v631_v41 = vadd.f32 1e-05, %v623_v33 }
 0x2fd   : > { %v601_v34 = vpop.permute.xlu1 %600 }
 0x2fe   : > { %v622_v35 = vsub.f32 %v1997_v53, %v601_v34  ;;  %v605_v40 = vpop.permute.xlu0 %604 }
 0x2ff   : > { %v624_v42 = vsub.f32 %v2004_v56, %v605_v40 }
 0x300   : > { %v630_v43 = vadd.f32 1e-05, %v622_v35 }
 0x301   : > { %v632_v44 = vadd.f32 1e-05, %v624_v42  ;;  %v607_v45 = vpop.permute.xlu1 %606 }
 0x302   : > { %1655 = vrsqrt.f32 %v630_v43  ;;  %v625_v47 = vsub.f32 %v2000_v54, %v607_v45  ;;  %v609_v48 = vpop.permute.xlu0 %608 }
 0x303   : > { %1657 = vrsqrt.f32 %v631_v41  ;;  %v626_v52 = vsub.f32 %v2014_v60, %v609_v48 }
 0x304   : > { %1659 = vrsqrt.f32 %v632_v44  ;;  %v633_v49 = vadd.f32 1e-05, %v625_v47 }
 0x305   : > { %v1652_v50 = vpop.eup %1651  ;;  %v611_v51 = vpop.permute.xlu1 %610  ;;  %v634_v62 = vadd.f32 1e-05, %v626_v52 }
 0x306   : > { %1661 = vrsqrt.f32 %v633_v49  ;;  %v627_v53 = vsub.f32 %v2010_v58, %v611_v51  ;;  %v717_v55 = vpop.permute.xlu0 %716  ;;  %v1654_v59 = vpop.eup %1653 }
 0x307   : > { %v740_v57 = vmul.f32 %v1652_v50, %v717_v55 }
 0x308   : > { %v635_v56 = vadd.f32 1e-05, %v627_v53 }
 0x309   : > { %v719_v61 = vpop.permute.xlu1 %718  ;;  %750 = vperm.xlu1 %1634, %v740_v57  }
 0x30a   : > { %1663 = vrsqrt.f32 %v635_v56  ;;  %v741_v54 = vmul.f32 %v1654_v59, %v719_v61  ;;  %v721_v63 = vpop.permute.xlu0 %720 }
 0x30b   : > { %1665 = vrsqrt.f32 %v634_v62 }
 0x30c   : > { %v1656_v3 = vpop.eup %1655  ;;  %755 = vperm.xlu0 %1633, %v741_v54  }
 0x30d   : > { %v1658_v5 = vpop.eup %1657  ;;  %v742_v8 = vmul.f32 %v1656_v3, %v721_v63  ;;  %v723_v9 = vpop.permute.xlu1 %722 }
 0x30e   : > { %v1660_v10 = vpop.eup %1659  ;;  %v743_v60 = vmul.f32 %v1658_v5, %v723_v9  ;;  %v725_v11 = vpop.permute.xlu0 %724 }
 0x30f   : > { %760 = vperm.xlu1 %1634, %v742_v8   ;;  %v744_v12 = vmul.f32 %v1660_v10, %v725_v11 }
 0x310   : > { %v1662_v58 = vpop.eup %1661  ;;  %765 = vperm.xlu0 %1633, %v743_v60  }
 0x311   : > { %v727_v13 = vpop.permute.xlu1 %726 }
 0x312   : > { %v745_v16 = vmul.f32 %v1662_v58, %v727_v13  ;;  %v729_v23 = vpop.permute.xlu0 %728 }
 0x313   : > { %770 = vperm.xlu1 %1634, %v744_v12  }
 0x314   : > { %v1664_v17 = vpop.eup %1663  ;;  %775 = vperm.xlu0 %1633, %v745_v16  }
 0x315   : > { %v731_v18 = vpop.permute.xlu1 %730  ;;  %v1666_v22 = vpop.eup %1665 }
 0x316   : > { %v747_v21 = vmul.f32 %v1664_v17, %v731_v18  ;;  %v746_v28 = vmul.f32 %v1666_v22, %v729_v23 }
 0x317   : > { %1635 = vset.pattern.permute.xlu1 %v1731_v46 }
 0x318   : > { %785 = vperm.xlu0 %1633, %v747_v21   ;;  %844 = vperm.xlu1 %1635, %v810_v20  }
 0x31c   : > { %1636 = vset.pattern.permute.xlu1 %v1733_v19  ;;  %1638 = vset.pattern.permute.xlu0 %v1731_v46 }
 0x31d   : > { %780 = vperm.xlu1 %1636, %v746_v28  }
 0x321   : > { %1637 = vset.pattern.permute.xlu1 %v1731_v46 }
 0x322   : > { %849 = vperm.xlu1 %1637, %v811_v29  }
 0x323   : > { %v647_v41 = vpop.permute.xlu0 %646 }
 0x324   : > { %v684_v48 = vsub.f32 %v1834_v2, %v647_v41  ;;  %v685_v49 = vsub.f32 %v1839_v4, %v647_v41 }
 0x326   : > { %v652_v30 = vpop.permute.xlu1 %651 }
 0x327   : > { %v815_v19 = vpop.permute.xlu0 %814  ;;  %v686_v51 = vsub.f32 %v1844_v6, %v652_v30  ;;  %v687_v52 = vsub.f32 %v1847_v7, %v652_v30 }
 0x32a   : > { %v657_v31 = vpop.permute.xlu1 %656 }
 0x32b   : > { %v825_v44 = vpop.permute.xlu0 %824  ;;  %v688_v61 = vsub.f32 %v1860_v14, %v657_v31  ;;  %v689_v62 = vsub.f32 %v1863_v15, %v657_v31 }
 0x32e   : > { %v662_v32 = vpop.permute.xlu1 %661 }
 0x32f   : > { %v835_v47 = vpop.permute.xlu0 %834  ;;  %v690_v54 = vsub.f32 %v1828_v0, %v662_v32  ;;  %v691_v2 = vsub.f32 %v1831_v1, %v662_v32 }
 0x332   : > { %v820_v33 = vpop.permute.xlu1 %819 }
 0x336   : > { %v667_v34 = vpop.permute.xlu1 %666 }
 0x337   : > { %v692_v7 = vsub.f32 %v1882_v26, %v667_v34  ;;  %v693_v15 = vsub.f32 %v1885_v27, %v667_v34 }
 0x33a   : > { %v672_v35 = vpop.permute.xlu1 %671 }
 0x33b   : > { %v694_v0 = vsub.f32 %v1876_v24, %v672_v35  ;;  %v695_v13 = vsub.f32 %v1879_v25, %v672_v35 }
 0x33e   : > { %v830_v40 = vpop.permute.xlu1 %829 }
 0x342   : > { %v2101_v42 = vpop.permute.xlu1 %676 }
 0x343   : > { %v696_v34 = vsub.f32 %v1906_v38, %v2101_v42  ;;  %v697_v35 = vsub.f32 %v1909_v39, %v2101_v42  ;;  %v1640_v39 = vld [vmem:[%s2269_s5 + $0x30] sm:$0xff]   ;;  %v1643_v42 = vld [vmem:[%s2269_s5 + $0x8] sm:$0xff]  }
 0x346   : > { %v2103_v43 = vpop.permute.xlu1 %681 }
 0x34a   : > { %v840_v45 = vpop.permute.xlu1 %839 }
 0x388   : > { %v751_v50 = vpop.permute.xlu1 %750 }
 0x389   : > { %v788_v53 = vmul.f32 %v751_v50, %v684_v48  ;;  %v789_v55 = vmul.f32 %v751_v50, %v685_v49 }
 0x38b   : > { %v756_v57 = vpop.permute.xlu0 %755  ;;  %v852_v63 = vadd.f32 %v815_v19, %v788_v53  ;;  %v853_v4 = vadd.f32 %v815_v19, %v789_v55  ;;  %v698_v19 = vsub.f32 %v1900_v36, %v2103_v43  ;;  %v1639_v36 = vld [vmem:[%s2269_s5 + $0x28] sm:$0xff]  }
 0x38c   : > { %v790_v56 = vmul.f32 %v756_v57, %v686_v51  ;;  %v791_v59 = vmul.f32 %v756_v57, %v687_v52 }
 0x38e   : > { %v854_v3 = vadd.f32 %v820_v33, %v790_v56  ;;  %v855_v5 = vadd.f32 %v820_v33, %v791_v59  ;;  %v761_v6 = vpop.permute.xlu1 %760  ;;  %v1645_v56 = vld [vmem:[%s2269_s5 + $0x10] sm:$0xff]   ;;  %v1644_v59 = vld [vmem:[%s2269_s5 + $0x40] sm:$0xff]  }
 0x38f   : > { %v792_v8 = vmul.f32 %v761_v6, %v688_v61  ;;  %v793_v9 = vmul.f32 %v761_v6, %v689_v62  ;;  %v766_v10 = vpop.permute.xlu0 %765  ;;  %v1647_v61 = vld [vmem:[%s2269_s5 + $0x18] sm:$0xff]   ;;  %v1646_v62 = vld [vmem:[%s2269_s5 + $0x48] sm:$0xff]  }
 0x390   : > { %v868_v60 = vpack.c.bf16 %v854_v3, %v852_v63  ;;  %v794_v11 = vmul.f32 %v766_v10, %v690_v54  ;;  %v795_v58 = vmul.f32 %v766_v10, %v691_v2  ;;  %v869_v14 = vpack.c.bf16 %v855_v5, %v853_v4  ;;  %v1649_v54 = vld [vmem:[%s2269_s5 + $0x20] sm:$0xff]   ;;  %v1648_v2 = vld [vmem:[%s2269_s5 + $0x50] sm:$0xff]   ;;  %v1650_v63 = vld [vmem:[%s2269_s5 + $0x58] sm:$0xff]  }
 0x391   : > { %v856_v12 = vadd.f32 %v825_v44, %v792_v8  ;;  %v857_v1 = vadd.f32 %v825_v44, %v793_v9  ;;  %v699_v44 = vsub.f32 %v1903_v37, %v2103_v43  ;;  %v1641_v37 = vld [vmem:[%s2269_s5] sm:$0xff]   ;;  %v1642_v43 = vld [vmem:[%s2269_s5 + $0x38] sm:$0xff]  }
 0x392   : > { %v858_v16 = vadd.f32 %v830_v40, %v794_v11  ;;  %v859_v17 = vadd.f32 %v830_v40, %v795_v58  ;;  %v771_v18 = vpop.permute.xlu1 %770  ;;  %996 = vmatprep.subr.bf16.mxu0 %v869_v14  ;;  %1577 = vmatprep.subr.bf16.mxu1 %v869_v14 }
 0x393   : > { %v796_v26 = vmul.f32 %v771_v18, %v692_v7  ;;  %v797_v20 = vmul.f32 %v771_v18, %v693_v15  ;;  %997 = vmatpush1.bf16.msra.mxu0 %v868_v60  ;;  %1581 = vmatpush1.bf16.msra.mxu1 %v868_v60  ;;  %v776_v21 = vpop.permute.xlu0 %775 }
 0x394   : > { %v870_v22 = vpack.c.bf16 %v858_v16, %v856_v12  ;;  %v798_v23 = vmul.f32 %v776_v21, %v694_v0  ;;  %v799_v28 = vmul.f32 %v776_v21, %v695_v13  ;;  %v871_v27 = vpack.c.bf16 %v859_v17, %v857_v1 }
 0x395   : > { %v860_v29 = vadd.f32 %v835_v47, %v796_v26  ;;  %v861_v24 = vadd.f32 %v835_v47, %v797_v20 }
 0x396   : > { %v862_v30 = vadd.f32 %v840_v45, %v798_v23  ;;  %v863_v31 = vadd.f32 %v840_v45, %v799_v28  ;;  %998 = vmatprep.subr.bf16.mxu0 %v871_v27  ;;  %1578 = vmatprep.subr.bf16.mxu1 %v871_v27 }
 0x397   : > { %v845_v25 = vpop.permute.xlu1 %844  ;;  %999 = vmatpush1.bf16.msra.mxu0 %v870_v22  ;;  %1582 = vmatpush1.bf16.msra.mxu1 %v870_v22  ;;  %v786_v41 = vpop.permute.xlu0 %785 }
 0x398   : > { %v872_v32 = vpack.c.bf16 %v862_v30, %v860_v29  ;;  %v873_v33 = vpack.c.bf16 %v863_v31, %v861_v24  ;;  %v802_v48 = vmul.f32 %v786_v41, %v698_v19  ;;  %v803_v49 = vmul.f32 %v786_v41, %v699_v44 }
 0x39a   : > { %1000 = vmatprep.subr.bf16.mxu0 %v873_v33  ;;  %1579 = vmatprep.subr.bf16.mxu1 %v873_v33 }
 0x39b   : > { %1001 = vmatpush1.bf16.msra.mxu0 %v872_v32  ;;  %1583 = vmatpush1.bf16.msra.mxu1 %v872_v32 }
 0x39c   : > { %v781_v40 = vpop.permute.xlu1 %780 }
 0x39d   : > { %v800_v45 = vmul.f32 %v781_v40, %v696_v34  ;;  %v801_v47 = vmul.f32 %v781_v40, %v697_v35 }
 0x39f   : > { %v864_v51 = vadd.f32 %v845_v25, %v800_v45  ;;  %v865_v52 = vadd.f32 %v845_v25, %v801_v47 }
 0x3a1   : > { %v850_v50 = vpop.permute.xlu1 %849 }
 0x3a2   : > { %v866_v53 = vadd.f32 %v850_v50, %v802_v48  ;;  %v867_v38 = vadd.f32 %v850_v50, %v803_v49 }
 0x3a4   : > { %v874_v55 = vpack.c.bf16 %v866_v53, %v864_v51  ;;  %v875_v57 = vpack.c.bf16 %v867_v38, %v865_v52 }
 0x3a6   : > { %1002 = vmatprep.subr.bf16.mxu0 %v875_v57  ;;  %1580 = vmatprep.subr.bf16.mxu1 %v875_v57 }
 0x3a7   : > { %1003 = vmatpush1.bf16.msra.mxu0 %v874_v55  ;;  %1584 = vmatpush1.bf16.msra.mxu1 %v874_v55 }
 0x3aa   : > { %1428 = vmatmul.mubr.msk.bf16.vlgmr.msra.gmra.mrb[8].mxu1 %vm344_vm0, %v1639_v36  ;;  %1423 = vmatmul.mubr.msk.bf16.vlgmr.msra.gmra.mrb[4].mxu0 %vm344_vm0, %v1641_v37 }
 0x3ab   : > { %1088 = vmatprep.mubr.bf16.mxu1 %v1731_v46  ;;  %1038 = vmatprep.mubr.bf16.mxu0 %v1731_v46 }
 0x3b2   : > { %1429 = vmatmul.mubr.msk.bf16.gmra.mrb[12].mxu1 %vm344_vm0, %v1640_v39  ;;  %1424 = vmatmul.mubr.msk.bf16.gmra.mrb[8].mxu0 %vm344_vm0, %v1643_v42 }
 0x3b3   : > { %1098 = vmatprep.mubr.bf16.mxu1 %v1731_v46  ;;  %1048 = vmatprep.mubr.bf16.mxu0 %v1731_v46 }
 0x3ba   : > { %1430 = vmatmul.mubr.msk.bf16.gmra.mrb[16].mxu1 %vm344_vm0, %v1642_v43  ;;  %1425 = vmatmul.mubr.msk.bf16.gmra.mrb[12].mxu0 %vm344_vm0, %v1645_v56 }
 0x3bb   : > { %1108 = vmatprep.mubr.bf16.mxu1 %v1731_v46  ;;  %1058 = vmatprep.mubr.bf16.mxu0 %v1731_v46 }
 0x3c2   : > { %1431 = vmatmul.mubr.msk.bf16.gmra.mrb[20].mxu1 %vm344_vm0, %v1644_v59  ;;  %1426 = vmatmul.mubr.msk.bf16.gmra.mrb[16].mxu0 %vm344_vm0, %v1647_v61 }
 0x3c3   : > { %1118 = vmatprep.mubr.bf16.mxu1 %v1731_v46  ;;  %1068 = vmatprep.mubr.bf16.mxu0 %v1731_v46 }
 0x3ca   : > { %1432 = vmatmul.mubr.msk.bf16.gmra.mrb[24].mxu1 %vm344_vm0, %v1646_v62  ;;  %1427 = vmatmul.mubr.msk.bf16.gmra.mrb[20].mxu0 %vm344_vm0, %v1649_v54 }
 0x3cb   : > { %1128 = vmatprep.mubr.bf16.mxu1 %v1731_v46 }
 0x3d2   : > { %1433 = vmatmul.mubr.msk.bf16.gmra.mrb[28].mxu1 %vm344_vm0, %v1648_v2 }
 0x3d3   : > { %1138 = vmatprep.mubr.bf16.mxu1 %v1731_v46 }
 0x3da   : > { %1434 = vmatmul.mubr.msk.bf16.gmra.mrb[32].mxu1 %vm344_vm0, %v1650_v63 }
 0x47d   : > { %v1080_v4 = vpop.f32.mrb[8].mxu1  ;;  %v1030_v3 = vpop.f32.mrb[4].mxu0 }
 0x47e   : > { %v1082_v5 = vpop.f32.mrb[9].mxu1  ;;  %v1032_v6 = vpop.f32.mrb[5].mxu0 }
 0x47f   : > { %v1473_v7 = vpack.c.bf16 %v1082_v5, %v1080_v4  ;;  %v1084_v8 = vpop.f32.mrb[10].mxu1  ;;  %v1463_v9 = vpack.c.bf16 %v1032_v6, %v1030_v3  ;;  %v1034_v10 = vpop.f32.mrb[6].mxu0 }
 0x480   : > { %v1086_v60 = vpop.f32.mrb[11].mxu1  ;;  %v1036_v11 = vpop.f32.mrb[7].mxu0 }
 0x481   : > { %1303 = vst [vmem:[%s2186_s28 + $0x50] sm:$0xff] %v1473_v7  ;;  %v1474_v46 = vpack.c.bf16 %v1086_v60, %v1084_v8  ;;  %1293 = vst [vmem:[%s2186_s28] sm:$0xff] %v1463_v9  ;;  %v1464_v58 = vpack.c.bf16 %v1036_v11, %v1034_v10 }
 0x483   : > { %1304 = vst [vmem:[%s2186_s28 + $0x58] sm:$0xff] %v1474_v46  ;;  %1294 = vst [vmem:[%s2186_s28 + $0x8] sm:$0xff] %v1464_v58 }
 0x485   : > { %v1090_v14 = vpop.f32.mrb[12].mxu1  ;;  %v1040_v15 = vpop.f32.mrb[8].mxu0 }
 0x486   : > { %v1092_v0 = vpop.f32.mrb[13].mxu1  ;;  %v1042_v12 = vpop.f32.mrb[9].mxu0 }
 0x487   : > { %v1475_v1 = vpack.c.bf16 %v1092_v0, %v1090_v14  ;;  %v1094_v13 = vpop.f32.mrb[14].mxu1  ;;  %v1465_v16 = vpack.c.bf16 %v1042_v12, %v1040_v15  ;;  %v1044_v17 = vpop.f32.mrb[10].mxu0 }
 0x488   : > { %v1096_v18 = vpop.f32.mrb[15].mxu1  ;;  %v1046_v26 = vpop.f32.mrb[11].mxu0 }
 0x489   : > { %1305 = vst [vmem:[%s2186_s28 + $0x60] sm:$0xff] %v1475_v1  ;;  %v1476_v20 = vpack.c.bf16 %v1096_v18, %v1094_v13  ;;  %1295 = vst [vmem:[%s2186_s28 + $0x10] sm:$0xff] %v1465_v16  ;;  %v1466_v21 = vpack.c.bf16 %v1046_v26, %v1044_v17 }
 0x48b   : > { %1306 = vst [vmem:[%s2186_s28 + $0x68] sm:$0xff] %v1476_v20  ;;  %1296 = vst [vmem:[%s2186_s28 + $0x18] sm:$0xff] %v1466_v21 }
 0x48d   : > { %v1100_v22 = vpop.f32.mrb[16].mxu1  ;;  %v1050_v23 = vpop.f32.mrb[12].mxu0 }
 0x48e   : > { %v1102_v28 = vpop.f32.mrb[17].mxu1  ;;  %v1052_v27 = vpop.f32.mrb[13].mxu0 }
 0x48f   : > { %v1477_v29 = vpack.c.bf16 %v1102_v28, %v1100_v22  ;;  %v1104_v24 = vpop.f32.mrb[18].mxu1  ;;  %v1467_v30 = vpack.c.bf16 %v1052_v27, %v1050_v23  ;;  %v1054_v31 = vpop.f32.mrb[14].mxu0 }
 0x490   : > { %v1106_v25 = vpop.f32.mrb[19].mxu1  ;;  %v1056_v32 = vpop.f32.mrb[15].mxu0 }
 0x491   : > { %1307 = vst [vmem:[%s2186_s28 + $0x70] sm:$0xff] %v1477_v29  ;;  %v1478_v33 = vpack.c.bf16 %v1106_v25, %v1104_v24  ;;  %1297 = vst [vmem:[%s2186_s28 + $0x20] sm:$0xff] %v1467_v30  ;;  %v1468_v34 = vpack.c.bf16 %v1056_v32, %v1054_v31 }
 0x493   : > { %1308 = vst [vmem:[%s2186_s28 + $0x78] sm:$0xff] %v1478_v33  ;;  %1298 = vst [vmem:[%s2186_s28 + $0x28] sm:$0xff] %v1468_v34 }
 0x495   : > { %v1110_v35 = vpop.f32.mrb[20].mxu1  ;;  %v1060_v40 = vpop.f32.mrb[16].mxu0 }
 0x496   : > { %v1112_v41 = vpop.f32.mrb[21].mxu1  ;;  %v1062_v19 = vpop.f32.mrb[17].mxu0 }
 0x497   : > { %v1479_v44 = vpack.c.bf16 %v1112_v41, %v1110_v35  ;;  %v1114_v45 = vpop.f32.mrb[22].mxu1  ;;  %v1469_v47 = vpack.c.bf16 %v1062_v19, %v1060_v40  ;;  %v1064_v48 = vpop.f32.mrb[18].mxu0 }
 0x498   : > { %v1116_v49 = vpop.f32.mrb[23].mxu1  ;;  %v1066_v50 = vpop.f32.mrb[19].mxu0 }
 0x499   : > { %1309 = vst [vmem:[%s2186_s28 + $0x80] sm:$0xff] %v1479_v44  ;;  %v1480_v51 = vpack.c.bf16 %v1116_v49, %v1114_v45  ;;  %1299 = vst [vmem:[%s2186_s28 + $0x30] sm:$0xff] %v1469_v47  ;;  %v1470_v52 = vpack.c.bf16 %v1066_v50, %v1064_v48 }
 0x49b   : > { %1310 = vst [vmem:[%s2186_s28 + $0x88] sm:$0xff] %v1480_v51  ;;  %1300 = vst [vmem:[%s2186_s28 + $0x38] sm:$0xff] %v1470_v52 }
 0x49d   : > { %v1120_v53 = vpop.f32.mrb[24].mxu1  ;;  %v1070_v38 = vpop.f32.mrb[20].mxu0 }
 0x49e   : > { %v1122_v55 = vpop.f32.mrb[25].mxu1  ;;  %v1072_v57 = vpop.f32.mrb[21].mxu0 }
 0x49f   : > { %v1481_v36 = vpack.c.bf16 %v1122_v55, %v1120_v53  ;;  %v1124_v37 = vpop.f32.mrb[26].mxu1  ;;  %v1471_v39 = vpack.c.bf16 %v1072_v57, %v1070_v38  ;;  %v1074_v42 = vpop.f32.mrb[22].mxu0 }
 0x4a0   : > { %v1126_v43 = vpop.f32.mrb[27].mxu1  ;;  %v1076_v56 = vpop.f32.mrb[23].mxu0 }
 0x4a1   : > { %1311 = vst [vmem:[%s2186_s28 + $0x90] sm:$0xff] %v1481_v36  ;;  %v1482_v59 = vpack.c.bf16 %v1126_v43, %v1124_v37  ;;  %1301 = vst [vmem:[%s2186_s28 + $0x40] sm:$0xff] %v1471_v39  ;;  %v1472_v61 = vpack.c.bf16 %v1076_v56, %v1074_v42 }
 0x4a3   : > { %1312 = vst [vmem:[%s2186_s28 + $0x98] sm:$0xff] %v1482_v59  ;;  %1302 = vst [vmem:[%s2186_s28 + $0x48] sm:$0xff] %v1472_v61 }
 0x4a5   : > { %v1130_v62 = vpop.f32.mrb[28].mxu1 }
 0x4a6   : > { %v1132_v54 = vpop.f32.mrb[29].mxu1 }
 0x4a7   : > { %v1483_v2 = vpack.c.bf16 %v1132_v54, %v1130_v62  ;;  %v1134_v63 = vpop.f32.mrb[30].mxu1 }
 0x4a8   : > { %v1136_v4 = vpop.f32.mrb[31].mxu1 }
 0x4a9   : > { %1313 = vst [vmem:[%s2186_s28 + $0xa0] sm:$0xff] %v1483_v2  ;;  %v1484_v3 = vpack.c.bf16 %v1136_v4, %v1134_v63 }
 0x4ab   : > { %1314 = vst [vmem:[%s2186_s28 + $0xa8] sm:$0xff] %v1484_v3 }
 0x4ad   : > { %v1140_v5 = vpop.f32.mrb[32].mxu1 }
 0x4ae   : > { %v1142_v6 = vpop.f32.mrb[33].mxu1 }
 0x4af   : > { %v1485_v7 = vpack.c.bf16 %v1142_v6, %v1140_v5  ;;  %v1144_v8 = vpop.f32.mrb[34].mxu1 }
 0x4b0   : > { %v1146_v9 = vpop.f32.mrb[35].mxu1 }
 0x4b1   : > { %1315 = vst [vmem:[%s2186_s28 + $0xb0] sm:$0xff] %v1485_v7  ;;  %v1486_v10 = vpack.c.bf16 %v1146_v9, %v1144_v8 }
 0x4b3   : > { %1316 = vst [vmem:[%s2186_s28 + $0xb8] sm:$0xff] %v1486_v10 }
 0x4b4   : > { %1680 = shalt.err (!%p1677_p3)
}
 0x4b5   : > { %s1681_s17 = scalar_lea.hbm %s2215_s13, 3072  ;;  %s1685_s20 = scalar_lea.hbm %s2270_s6, 6144 }
 0x4b6   : > { %p1682_p4 = scmp.ne.s32.totalorder %s2215_s13, %s1681_s17  ;;  %p1686_p9 = scmp.lt.u32.totalorder %s2215_s13, %s2270_s6 }
 0x4b7   : > { %p1687_p10 = scmp.lt.u32.totalorder %s1685_s20, %s1681_s17  ;;  %p1689_p12 = scmp.lt.u32.totalorder %s1681_s17, %s2215_s13 }
 0x4b8   : > { %p1683_p7 = pnand %p1682_p4, %p1810_p5 }
 0x4b9   : > { %p1688_p11 = por %p1687_p10, %p1686_p9 }
 0x4ba   : > { %p1684_p8 = pneg %p1683_p7 }
 0x4bb   : > { %p1690_p13 = por %p1689_p12, %p1688_p11 }
 0x4bd   : > { %p1691_p0 = pnand %p1690_p13, %p1684_p8 }
 0x4bf   : > { %1694 = shalt.err (!%p1691_p0)
}
 0x4c0   : > { %s1735_s9 = smov 128   ;;  %s1736_s11 = smov 8  }
 0x4c1   : > { %1587 = dma.vmem_to_hbm [thread:$0]  (%p1810_p5), %s2217_s10, 3072, %s2215_s13, %s2223_s25, %s1735_s9, %s1735_s9, %s1736_s11  }
 0x4c2 PF: > { %p1593_p1 = scmp.ge.s32.totalorder %s1729_s24, 2  ;;  %s1346_s12 = sand.u32 1, %s1717_s21  }
 0x4c3   : > { %s1347_s14 = scalar_lea.sflag [#allocation3], %s1346_s12 }
 0x4c4   : > { %p1590_p2 = pnand %p1593_p1, %p1814_p6 }
 0x4c6   : > { %1712 = dma.done.wait (!%p1590_p2), %s1347_s14, 3072  }
 0x4c7   : > { %1714 = vsyncadd (!%p1590_p2), %s1347_s14, 4294964224  ;;  %p16_p3 = scmp.ge.s32.totalorder %s1797_s27, 4   ;;  %s2273_s21 = smov %s1721_s22 }
 0x4c8   : > { %s2274_s22 = smov %s1725_s23  ;;  %s2275_s23 = smov %s1808_s30 }
 0x4c9   : > { %s2276_s24 = smov %s1797_s27  ;;  %18 = sbr.rel (!%p16_p3) target bundleno = 3 (0x3), region = 79 }
 0x4d0   :  { %1352 = vsyncpa [#allocation3], 1 }
 0x4d1   :  { %1354 = vsyncpa [#allocation3 + $0x1], 1 }

</bundles_post_ra>
